<compile_context>
chip_gen: v7x
topology: tpu7x:2x2x1
jax: 0.10.0
libtpu: 0.0.40
codegen_flags: <defaults>
</compile_context>

<pallas_src>
import math

import jax
import jax.numpy as jnp
from jax.experimental import pallas as pl
from jax.experimental.pallas import tpu as pltpu


# ----------------------------------------------------------------------------
# Tiling helpers (all plain Python on static shapes).
# ----------------------------------------------------------------------------
_VMEM_TILE_BUDGET = 24 * 1024 * 1024   # double-buffered tile bytes allowed
_VMEM_LIMIT_BYTES = 48 * 1024 * 1024   # scoped-VMEM ceiling (v7x-safe)
_TM_CAP, _TN_CAP, _TK_CAP = 512, 512, 1024


def _round_up(v, m):
    return ((v + m - 1) // m) * m


def _pick_tile(dim, align, cap):
    """Pick (tile, padded_dim): tile % align == 0, padded_dim % tile == 0.

    Prefers the minimally padded dim itself when it fits under `cap`; then a
    full-cap tile if the extra padding waste stays under 1/8 of `dim`; else the
    largest aligned divisor of the minimally padded dim.
    """
    dim_a = _round_up(dim, align)
    if dim_a <= cap:
        return dim_a, dim_a
    cap = (cap // align) * align
    if (_round_up(dim, cap) - dim) * 8 <= dim:
        return cap, _round_up(dim, cap)
    t = cap
    while t >= align:
        if dim_a % t == 0:
            return t, dim_a
        t -= align
    return align, dim_a


def _split_for_megacore(Cp, tn):
    """If the whole problem is a single block, split the class axis in two so
    both TensorCores (v7x) get a block.  Returns a new tn dividing Cp."""
    half = (Cp // 2 // 128) * 128
    t = half
    while t >= 128:
        if Cp % t == 0:
            return t
        t -= 128
    return tn


# ----------------------------------------------------------------------------
# Kernels.
# ----------------------------------------------------------------------------
def _linear_kernel_nok(x_ref, w_ref, b_ref, o_ref):
    # x_ref: (tm, Fp)  w_ref: (Fp, tn)  b_ref: (1, tn)  o_ref: (tm, tn) f32.
    # Full-K in one shot: no accumulator scratch, no init/finalize branches.
    o_ref[...] = (
        jnp.dot(x_ref[...], w_ref[...], preferred_element_type=jnp.float32)
        + b_ref[...]
    ).astype(o_ref.dtype)


def _linear_kernel_k(x_ref, w_ref, b_ref, o_ref, acc_ref):
    # x_ref: (tm, tk)  w_ref: (tk, tn)  b_ref: (1, tn)  acc_ref: (tm, tn) f32.
    k = pl.program_id(2)

    @pl.when(k == 0)
    def _():
        acc_ref[...] = jnp.zeros_like(acc_ref)

    acc_ref[...] += jnp.dot(
        x_ref[...], w_ref[...], preferred_element_type=jnp.float32
    )

    @pl.when(k == pl.num_programs(2) - 1)
    def _():
        o_ref[...] = (acc_ref[...] + b_ref[...]).astype(o_ref.dtype)


# ----------------------------------------------------------------------------
# Wrapper.
# ----------------------------------------------------------------------------
def attribute_decoder_nodrop(x, weight, bias, *, compute_dtype=None):
    """y = x @ weight.T + bias (AttributeDecoderNoDrop.forward).

    Args:
      x:      (B, inp_feat) float32
      weight: (n_classes, inp_feat) float32 (PyTorch nn.Linear layout)
      bias:   (n_classes,) float32
      compute_dtype: optional dtype (e.g. jnp.bfloat16) for the matmul
        operands; accumulation and output stay float32.
    Returns:
      (B, n_classes) float32
    """
    B, F = x.shape
    C, F2 = weight.shape
    assert F == F2, "weight/in_features mismatch"
    assert bias.shape == (C,)

    # --- tile / padding selection (minimal (8,128) padding, divisor tiles) ---
    tm, Bp = _pick_tile(B, 8, _TM_CAP)
    tn, Cp = _pick_tile(C, 128, _TN_CAP)
    Fp_min = _round_up(F, 128)

    # Give both TensorCores work if the problem would otherwise be one block.
    if Bp // tm == 1 and Cp // tn == 1 and Cp >= 256:
        tn = _split_for_megacore(Cp, tn)

    itemsize = 2 if compute_dtype == jnp.bfloat16 else 4
    vmem_2d = 2 * (
        itemsize * (tm * Fp_min + Fp_min * tn + tn) + 4 * tm * tn
    )
    if vmem_2d <= _VMEM_TILE_BUDGET:
        use_k_axis = False
        tk, Fp = Fp_min, Fp_min
    else:
        use_k_axis = True
        tk, Fp = _pick_tile(F, 128, _TK_CAP)

    # --- operand prep: pad to (Bp, Fp)/(Fp, Cp)/(Cp,), transpose W once -----
    if (Bp, Fp) != (B, F):
        x = jnp.pad(x, ((0, Bp - B), (0, Fp - F)))
    w_t = weight.T                       # (F, C): one-time HBM-level transpose
    if (Fp, Cp) != (F, C):
        w_t = jnp.pad(w_t, ((0, Fp - F), (0, Cp - C)))
    if Cp != C:
        bias = jnp.pad(bias, (0, Cp - C))
    bias_row = bias.reshape(1, Cp).astype(jnp.float32)

    if compute_dtype is not None:
        # TODO(synk): store the weight in bf16 at the parameter level to also
        # halve the HBM weight bytes; casting here only speeds up the MXU.
        x = x.astype(compute_dtype)
        w_t = w_t.astype(compute_dtype)

    cost = pl.CostEstimate(
        flops=2 * Bp * Fp * Cp,
        transcendentals=0,
        bytes_accessed=itemsize * (Bp * Fp + Fp * Cp) + 4 * Bp * Cp,
    )

    if not use_k_axis:
        grid = (Bp // tm, Cp // tn)
        out = pl.pallas_call(
            _linear_kernel_nok,
            out_shape=jax.ShapeDtypeStruct((Bp, Cp), jnp.float32),
            grid_spec=pltpu.PrefetchScalarGridSpec(
                num_scalar_prefetch=0,
                grid=grid,
                in_specs=[
                    pl.BlockSpec((tm, Fp), lambda i, j: (i, 0)),   # x block
                    pl.BlockSpec((Fp, tn), lambda i, j: (0, j)),   # W^T block
                    pl.BlockSpec((1, tn), lambda i, j: (0, j)),    # bias row
                ],
                out_specs=pl.BlockSpec((tm, tn), lambda i, j: (i, j)),
            ),
            compiler_params=pltpu.CompilerParams(
                dimension_semantics=("parallel", "parallel"),
                vmem_limit_bytes=_VMEM_LIMIT_BYTES,
            ),
            cost_estimate=cost,
        )(x, w_t, bias_row)
    else:
        grid = (Bp // tm, Cp // tn, Fp // tk)
        out = pl.pallas_call(
            _linear_kernel_k,
            out_shape=jax.ShapeDtypeStruct((Bp, Cp), jnp.float32),
            grid_spec=pltpu.PrefetchScalarGridSpec(
                num_scalar_prefetch=0,
                grid=grid,
                in_specs=[
                    pl.BlockSpec((tm, tk), lambda i, j, k: (i, k)),
                    pl.BlockSpec((tk, tn), lambda i, j, k: (k, j)),
                    pl.BlockSpec((1, tn), lambda i, j, k: (0, j)),
                ],
                out_specs=pl.BlockSpec((tm, tn), lambda i, j, k: (i, j)),
                scratch_shapes=[pltpu.VMEM((tm, tn), jnp.float32)],
            ),
            compiler_params=pltpu.CompilerParams(
                dimension_semantics=("parallel", "parallel", "arbitrary"),
                vmem_limit_bytes=_VMEM_LIMIT_BYTES,
            ),
            cost_estimate=cost,
        )(x, w_t, bias_row)

    if (Bp, Cp) != (B, C):
        out = out[:B, :C]
    return out


def init_params(key, inp_feat, n_classes):
    """Deterministic init matching the module: xavier_uniform weight, zero bias."""
    bound = math.sqrt(6.0 / (inp_feat + n_classes))
    weight = jax.random.uniform(
        key, (n_classes, inp_feat), jnp.float32, minval=-bound, maxval=bound
    )
    bias = jnp.zeros((n_classes,), jnp.float32)
    return weight, bias


if __name__ == "__main__":
    key = jax.random.PRNGKey(0)
    k_x, k_w = jax.random.split(key)

    # Small shapes consistent with the module.
    batch, inp_feat, n_classes = 8, 32, 16
    x = jax.random.normal(k_x, (batch, inp_feat), jnp.float32)
    weight, bias = init_params(k_w, inp_feat, n_classes)

    y = jax.block_until_ready(attribute_decoder_nodrop(x, weight, bias))
    y_ref = x @ weight.T + bias
    assert y.shape == (batch, n_classes)
    assert jnp.allclose(y, y_ref, atol=1e-5, rtol=1e-5)

    # Larger, non-aligned shape: exercises minimal padding + megacore split.
    k_x2, k_w2 = jax.random.split(k_w)
    x2 = jax.random.normal(k_x2, (300, 520), jnp.float32)
    w2, b2 = init_params(k_w2, 520, 200)
    b2 = b2 + 0.5  # nonzero bias to exercise the epilogue
    y2 = jax.block_until_ready(attribute_decoder_nodrop(x2, w2, b2))
    y2_ref = x2 @ w2.T + b2
    assert y2.shape == (300, 200)
    assert jnp.allclose(y2, y2_ref, atol=1e-4, rtol=1e-4)

    # Optional bf16-operand path (f32 accumulation), loose tolerance.
    y3 = jax.block_until_ready(
        attribute_decoder_nodrop(x2, w2, b2, compute_dtype=jnp.bfloat16)
    )
    assert jnp.allclose(y3, y2_ref, atol=5e-2, rtol=5e-2)

    print("KERNEL_OK")
</pallas_src>

<mosaic_0001>
module attributes {stable_mosaic.version = 11 : i64} {
  func.func @_linear_kernel_nok(%arg0: i32, %arg1: i32, %arg2: memref<8x128xf32, #tpu.memory_space<vmem>>, %arg3: memref<128x128xf32, #tpu.memory_space<vmem>>, %arg4: memref<1x128xf32, #tpu.memory_space<vmem>>, %arg5: memref<8x128xf32, #tpu.memory_space<vmem>>) attributes {dimension_semantics = [#tpu.dimension_semantics<parallel>, #tpu.dimension_semantics<parallel>], iteration_bounds = array<i64: 1, 1>, scalar_prefetch = 0 : i64, scratch_operands = 0 : i64, tpu.core_type = #tpu.core_type<tc>, window_params = [{transform_indices = @transform_0, window_bounds = array<i64: 8, 128>}, {transform_indices = @transform_1, window_bounds = array<i64: 128, 128>}, {transform_indices = @transform_2, window_bounds = array<i64: 1, 128>}, {transform_indices = @transform_3, window_bounds = array<i64: 8, 128>}]} {
    %c0 = arith.constant 0 : index
    %c0_0 = arith.constant 0 : index
    %0 = vector.load %arg2[%c0, %c0_0] : memref<8x128xf32, #tpu.memory_space<vmem>>, vector<8x128xf32>
    %c0_1 = arith.constant 0 : index
    %c0_2 = arith.constant 0 : index
    %1 = vector.load %arg3[%c0_1, %c0_2] : memref<128x128xf32, #tpu.memory_space<vmem>>, vector<128x128xf32>
    %cst = arith.constant dense<0.000000e+00> : vector<8x128xf32>
    %2 = tpu.matmul %0, %1, %cst {dimension_numbers = #tpu.dot_dimension_numbers<[1], [0], [0], [1], [0, 0, 1, 1], [], []>} : vector<8x128xf32>, vector<128x128xf32>, vector<8x128xf32> -> vector<8x128xf32>
    %c0_3 = arith.constant 0 : index
    %c0_4 = arith.constant 0 : index
    %3 = vector.load %arg4[%c0_3, %c0_4] : memref<1x128xf32, #tpu.memory_space<vmem>>, vector<1x128xf32>
    %4 = vector.broadcast %3 : vector<1x128xf32> to vector<8x128xf32>
    %5 = arith.addf %2, %4 : vector<8x128xf32>
    %c0_5 = arith.constant 0 : index
    %c0_6 = arith.constant 0 : index
    %6 = vector.load %arg5[%c0_5, %c0_6] : memref<8x128xf32, #tpu.memory_space<vmem>>, vector<8x128xf32>
    tpu.vector_store %arg5[%c0_5, %c0_6], %5 {strides = array<i32>} : memref<8x128xf32, #tpu.memory_space<vmem>>, vector<8x128xf32>,
    return
  }
  func.func @transform_0(%arg0: i32, %arg1: i32) -> (i32, i32) {
    %c0_i32 = arith.constant 0 : i32
    %c0_i32_0 = arith.constant 0 : i32
    return %arg0, %c0_i32 : i32, i32
  }
  func.func @transform_1(%arg0: i32, %arg1: i32) -> (i32, i32) {
    %c0_i32 = arith.constant 0 : i32
    %c0_i32_0 = arith.constant 0 : i32
    return %c0_i32, %arg1 : i32, i32
  }
  func.func @transform_2(%arg0: i32, %arg1: i32) -> (i32, i32) {
    %c0_i32 = arith.constant 0 : i32
    %c0_i32_0 = arith.constant 0 : i32
    return %c0_i32, %arg1 : i32, i32
  }
  func.func @transform_3(%arg0: i32, %arg1: i32) -> (i32, i32) {
    %c0_i32 = arith.constant 0 : i32
    return %arg0, %arg1 : i32, i32
  }
}

</mosaic_0001>

<bundles_post_ra>
// kernel: tpu_custom_call.1
= control target key start
LH: loop header
LB: loop body
LE: loop exit
PB: predicated region body
PF: predicated region fallthrough
CT: control target
= control target key end

     0   :  { %8 = vsyncpa [#allocation3], 0  ;;  %s383_s0 = inlined_call_operand.hbm [shape: f32[8,128], index: 0, kind: input, shape index: {}]   ;;  %s384_s1 = inlined_call_operand.hbm [shape: f32[128,128], index: 1, kind: input, shape index: {}]   ;;  %s385_s2 = inlined_call_operand.vmem [shape: f32[1,128], index: 2, kind: input, shape index: {}]   ;;  %s386_s3 = inlined_call_operand.hbm [shape: f32[8,128], index: 3, kind: output, shape index: {}]  }
   0x1   :  { %9 = vsyncpa [#allocation6], 0 }
   0x2   :  { %10 = vsyncpa [#allocation4], 0  ;;  %s309_s12 = smov [#allocation2]   ;;  %s310_s14 = smov [#allocation5]  }
   0x3   :  { %s17_s13 = sshll.u32 %s309_s12, 4  ;;  %s26_s15 = sshll.u32 %s310_s14, 4  ;;  %s18_s13 = int_to_ptr.vmem [resolvable:$true] %s17_s13  ;;  %s337_s15 = int_to_ptr.vmem [resolvable:$true] %s26_s15 }
   0x4   :  { %s237_s18 = scalar_lea.hbm %s383_s0, 128 }
   0x5   :  { %p238_p0 = scmp.ne.s32.totalorder %s383_s0, %s237_s18  ;;  %p241_p1 = scmp.lt.u32.totalorder %s237_s18, %s383_s0 }
   0x7   :  { %p243_p2 = pnand %p241_p1, %p238_p0 }
   0x9   :  { %246 = shalt.err (!%p243_p2)
}
   0xa   :  { %s247_s23 = scalar_lea.vmem %s18_s13, 128  ;;  %p252_p4 = scmp.lt.s32.totalorder %s18_s13, %s18_s13 }
   0xb   :  { %p248_p3 = scmp.ne.s32.totalorder %s18_s13, %s247_s23  ;;  %p253_p5 = scmp.lt.s32.totalorder %s247_s23, %s247_s23 }
   0xd   :  { %p254_p6 = por %p253_p5, %p252_p4 }
   0xf   :  { %p255_p7 = pnand %p254_p6, %p248_p3 }
  0x11   :  { %258 = shalt.err (!%p255_p7)
}
  0x12   :  { %20 = dma.hbm_to_vmem [thread:$0]  %s383_s0, 128, %s18_s13, [#allocation3]  }
  0x13   :  { %s259_s28 = scalar_lea.hbm %s384_s1, 2048 }
  0x14   :  { %p260_p8 = scmp.ne.s32.totalorder %s384_s1, %s259_s28  ;;  %p263_p9 = scmp.lt.u32.totalorder %s259_s28, %s384_s1 }
  0x16   :  { %p265_p10 = pnand %p263_p9, %p260_p8 }
  0x18   :  { %268 = shalt.err (!%p265_p10)
}
  0x19   :  { %s269_s6 = scalar_lea.vmem %s337_s15, 2048  ;;  %p274_p12 = scmp.lt.s32.totalorder %s337_s15, %s337_s15 }
  0x1a   :  { %p270_p11 = scmp.ne.s32.totalorder %s337_s15, %s269_s6  ;;  %p275_p13 = scmp.lt.s32.totalorder %s269_s6, %s269_s6 }
  0x1c   :  { %p276_p0 = por %p275_p13, %p274_p12 }
  0x1e   :  { %p277_p1 = pnand %p276_p0, %p270_p11 }
  0x20   :  { %280 = shalt.err (!%p277_p1)
}
  0x21   :  { %s311_s0 = smov 128   ;;  %s312_s7 = smov 8  }
  0x22   :  { %32 = dma.hbm_to_vmem [thread:$0]  %s384_s1, 2048, %s337_s15, [#allocation6], %s311_s0, %s311_s0, %s312_s7  }
  0x23   :  { %303 = dma.done.wait [#allocation3], 128  }
  0x24   :  { %304 = vsyncadd [#allocation3], 4294967168 }
  0x25   :  { %305 = dma.done.wait [#allocation6], 2048  }
  0x26   :  { %306 = vsyncadd [#allocation6], 4294965248  ;;  %v313_v0 = vmov 0.0|0.0   ;;  %vm314_vm0 = vmmov 0   ;;  %v315_v1 = vmov 0.0   ;;  %v42_v2 = vld [vmem:[#allocation5] sm:$0xff] }
  0x27   :  { %205 = vmatprep.subr.bf16.mxu0 %v313_v0  ;;  %202 = vmatprep.mubr.msk.f32.mxu0 %vm314_vm0, %v315_v1  ;;  %v43_v3 = vld [vmem:[#allocation5 + $0x8] sm:$0xff]  ;;  %v44_v4 = vld [vmem:[#allocation5 + $0x10] sm:$0xff]  ;;  %v45_v6 = vld [vmem:[#allocation5 + $0x18] sm:$0xff]  ;;  %s316_s11 = smov [#allocation7]  }
  0x28   :  { %v206_v5 = vpack.c.bf16 %v43_v3, %v42_v2  ;;  %v209_v7 = vpack.c.bf16 %v45_v6, %v44_v4  ;;  %v46_v8 = vld [vmem:[#allocation5 + $0x20] sm:$0xff]  ;;  %v47_v9 = vld [vmem:[#allocation5 + $0x28] sm:$0xff]  ;;  %v48_v11 = vld [vmem:[#allocation5 + $0x30] sm:$0xff]  ;;  %s142_s12 = sshll.u32 %s316_s11, 4  ;;  %s143_s12 = int_to_ptr.vmem [resolvable:$true] %s142_s12 }
  0x29   :  { %v212_v10 = vpack.c.bf16 %v47_v9, %v46_v8  ;;  %v49_v12 = vld [vmem:[#allocation5 + $0x38] sm:$0xff]  ;;  %v50_v14 = vld [vmem:[#allocation5 + $0x40] sm:$0xff]  ;;  %v51_v15 = vld [vmem:[#allocation5 + $0x48] sm:$0xff]  ;;  %s281_s13 = scalar_lea.vmem %s143_s12, 128  ;;  %p286_p3 = scmp.lt.s32.totalorder %s143_s12, %s143_s12 }
  0x2a   :  { %207 = vmatpush3.bf16.msra.mxu0 %v206_v5  ;;  %v215_v13 = vpack.c.bf16 %v49_v12, %v48_v11  ;;  %v218_v16 = vpack.c.bf16 %v51_v15, %v50_v14  ;;  %v52_v17 = vld [vmem:[#allocation5 + $0x50] sm:$0xff]  ;;  %v53_v18 = vld [vmem:[#allocation5 + $0x58] sm:$0xff]  ;;  %v54_v20 = vld [vmem:[#allocation5 + $0x60] sm:$0xff]  ;;  %p282_p2 = scmp.ne.s32.totalorder %s143_s12, %s281_s13  ;;  %p287_p4 = scmp.lt.s32.totalorder %s281_s13, %s281_s13 }
  0x2b   :  { %208 = vmatprep.subr.bf16.mxu0 %v313_v0  ;;  %v221_v19 = vpack.c.bf16 %v53_v18, %v52_v17  ;;  %v55_v21 = vld [vmem:[#allocation5 + $0x68] sm:$0xff]  ;;  %v56_v23 = vld [vmem:[#allocation5 + $0x70] sm:$0xff]  ;;  %v57_v24 = vld [vmem:[#allocation5 + $0x78] sm:$0xff] }
  0x2c   :  { %v224_v22 = vpack.c.bf16 %v55_v21, %v54_v20  ;;  %v227_v25 = vpack.c.bf16 %v57_v24, %v56_v23  ;;  %v41_v26 = vld [vmem:[#allocation2] sm:$0xff]  ;;  %p288_p5 = por %p287_p4, %p286_p3 }
  0x2d   :  { %v152_v27 = vld [vmem:[%s385_s2] ss:$0 sm:$0xff] }
  0x2e   :  { %210 = vmatpush3.bf16.msra.mxu0 %v209_v7  ;;  %p289_p6 = pnand %p288_p5, %p282_p2 }
  0x2f   :  { %211 = vmatprep.subr.bf16.mxu0 %v313_v0 }
  0x32   :  { %213 = vmatpush3.bf16.msra.mxu0 %v212_v10 }
  0x33   :  { %214 = vmatprep.subr.bf16.mxu0 %v313_v0 }
  0x36   :  { %216 = vmatpush3.bf16.msra.mxu0 %v215_v13 }
  0x37   :  { %217 = vmatprep.subr.bf16.mxu0 %v313_v0 }
  0x3a   :  { %219 = vmatpush3.bf16.msra.mxu0 %v218_v16 }
  0x3b   :  { %220 = vmatprep.subr.bf16.mxu0 %v313_v0 }
  0x3e   :  { %222 = vmatpush3.bf16.msra.mxu0 %v221_v19 }
  0x3f   :  { %223 = vmatprep.subr.bf16.mxu0 %v313_v0 }
  0x42   :  { %225 = vmatpush3.bf16.msra.mxu0 %v224_v22 }
  0x43   :  { %226 = vmatprep.subr.bf16.mxu0 %v313_v0 }
  0x46   :  { %228 = vmatpush3.bf16.msra.mxu0 %v227_v25 }
  0x49   :  { %203 = vmatmul.mubr.f32.vlgmr.msra.gmra.mrb[0].mxu0 %v41_v26 }
 0x11c   :  { %v131_v28 = vpop.f32.mrb[0].mxu0 }
 0x11d   :  { %v132_v29 = vadd.f32 %v152_v27, %v131_v28  ;;  %v204_v30 = vpop.f32.mrb[1].mxu0 }
 0x11f   :  { %135 = vst [vmem:[#allocation7] sm:$0xff] %v132_v29 }
 0x120   :  { %292 = shalt.err (!%p289_p6)
}
 0x121   :  { %s293_s16 = scalar_lea.hbm %s386_s3, 128 }
 0x122   :  { %p294_p7 = scmp.ne.s32.totalorder %s386_s3, %s293_s16  ;;  %p297_p8 = scmp.lt.u32.totalorder %s293_s16, %s386_s3 }
 0x124   :  { %p299_p9 = pnand %p297_p8, %p294_p7 }
 0x126   :  { %302 = shalt.err (!%p299_p9)
}
 0x127   :  { %145 = dma.vmem_to_hbm [thread:$0]  %s143_s12, 128, %s386_s3, [#allocation4]  }
 0x128   :  { %307 = dma.done.wait [#allocation4], 128  }
 0x129   :  { %308 = vsyncadd [#allocation4], 4294967168 }
 0x12a   :  { %149 = vsyncpa [#allocation3], 1 }
 0x12b   :  { %150 = vsyncpa [#allocation6], 1 }
 0x12c   :  { %151 = vsyncpa [#allocation4], 1 }

</bundles_post_ra>
